<compile_context>
chip_gen: v5e
topology: v5e:2x2
jax: 0.10.0
libtpu: 0.0.40
codegen_flags: <defaults>
</compile_context>

<pallas_src>
import jax
import jax.numpy as jnp
from jax.experimental import pallas as pl
from jax.experimental.pallas import tpu as pltpu

EPS = 1e-5


def _round_up(x, m):
    return ((x + m - 1) // m) * m


def _vmem_budget_bytes():
    """Per-TensorCore VMEM budget with headroom, per generation."""
    cap = None
    try:
        info = pltpu.get_tpu_info()
        cap = int(getattr(info, "vmem_capacity_bytes", 0)) or None
    except Exception:
        cap = None
    if cap is None:
        cap = 64 << 20  # conservative default: v7x has 64 MiB / TensorCore
    # Leave >= 8 MiB headroom for compiler-internal scratch; do not request
    # more than ~100 MiB even on 128 MiB parts (v5e / v6e).
    return max(32 << 20, min(cap - (8 << 20), 100 << 20))


def prenorm_linear_kernel(x_ref, w_ref, bias_ref, o_ref, xn_ref):
    # x_ref:    (TM, D)   rows of the flattened input (re-used across j)
    # w_ref:    (D, TN)   Linear weight tile with gamma folded in (matmul dtype)
    # bias_ref: (1, TN)   Linear bias tile with beta folded in (f32)
    # o_ref:    (TM, TN)
    # xn_ref:   (TM, D)   VMEM scratch: normalized x in matmul dtype
    #
    # LayerNorm statistics are computed ONCE per row tile (first N tile) and
    # the normalized activations persist in VMEM scratch for the whole j
    # sweep. The j grid axis is "arbitrary", so the sweep runs in order on a
    # single core and the scratch stays valid.
    @pl.when(pl.program_id(1) == 0)
    def _():
        x = x_ref[...].astype(jnp.float32)
        mean = jnp.mean(x, axis=-1, keepdims=True)
        centered = x - mean
        var = jnp.mean(centered * centered, axis=-1, keepdims=True)
        # Note: zero-padded rows (M_pad > M) have var == 0; rsqrt(EPS) is
        # finite and centered == 0, so padded rows normalize to 0 and the
        # (nonzero-bias) padded outputs are sliced away by the wrapper.
        xn_ref[...] = (centered * jax.lax.rsqrt(var + EPS)).astype(xn_ref.dtype)

    # gamma/beta already folded into (w, bias) host-side, so the MXU sees the
    # plain normalized activations. Full-K dot, f32 accumulation.
    out = jnp.dot(xn_ref[...], w_ref[...], preferred_element_type=jnp.float32)
    o_ref[...] = (out + bias_ref[...]).astype(o_ref.dtype)


def prenorm_linear(x, gamma, beta, w, bias, *, tile_m=512, tile_n=512,
                   matmul_dtype=jnp.bfloat16, out_dtype=None):
    """x: (B, S, D) -> (B, S, H). Fused LayerNorm(dim) + Linear(dim, H)."""
    B, S, D = x.shape
    H = w.shape[1]
    M = B * S
    out_dtype = x.dtype if out_dtype is None else out_dtype

    # --- Fold LayerNorm affine into the Linear layer (one-time, host side) ---
    #   LN(x) @ w + b == ((x - mu) * inv) @ (gamma[:, None] * w) + (beta @ w + b)
    gamma = gamma.astype(jnp.float32)
    beta = beta.astype(jnp.float32)
    w32 = w.astype(jnp.float32)
    w_f = (gamma[:, None] * w32).astype(matmul_dtype)
    bias_f = (beta @ w32 + bias.astype(jnp.float32)).reshape(1, H)

    x_isz = jnp.dtype(x.dtype).itemsize
    w_isz = jnp.dtype(matmul_dtype).itemsize
    o_isz = jnp.dtype(out_dtype).itemsize

    vmem_budget = _vmem_budget_bytes()

    def _blk_bytes(tm, tn):
        return (2 * tm * D * x_isz        # x tiles (double-buffered)
                + 2 * D * tn * w_isz      # W tiles (double-buffered)
                + 2 * tn * 4              # bias tiles
                + 2 * tm * tn * o_isz     # out tiles (double-buffered)
                + tm * D * w_isz          # normalized-x scratch
                + 3 * tm * D * 4)         # transient f32 LN intermediates

    # --- Column tiling: keep W fully resident when it fits --------------------
    # With tile_n == H_pad the W block index is constant, so the folded weight
    # is DMA'd exactly once instead of once per row tile.
    tn_full = _round_up(H, 128)
    if 2 * D * tn_full * w_isz <= 0.4 * vmem_budget:
        tile_n_eff = tn_full
    else:
        tile_n_eff = min(_round_up(tile_n, 128), tn_full)
    H_pad = _round_up(H, tile_n_eff)

    # --- Row tiling: largest tile_m that fits the per-gen VMEM budget ---------
    row_align = 16 if x.dtype == jnp.bfloat16 else 8
    m_cap = _round_up(M, row_align)
    tm_eff = min(_round_up(tile_m, row_align), m_cap)
    while tm_eff > row_align and _blk_bytes(tm_eff, tile_n_eff) > vmem_budget:
        tm_eff = max(row_align, _round_up(tm_eff // 2, row_align))
    tile_m_eff = tm_eff
    M_pad = _round_up(M, tile_m_eff)

    x2 = x.reshape(M, D)
    if M_pad != M:
        x2 = jnp.pad(x2, ((0, M_pad - M), (0, 0)))
    if H_pad != H:
        w_f = jnp.pad(w_f, ((0, 0), (0, H_pad - H)))
        bias_f = jnp.pad(bias_f, ((0, 0), (0, H_pad - H)))

    grid = (M_pad // tile_m_eff, H_pad // tile_n_eff)
    w_resident = grid[1] == 1

    # --- Cost estimate reflecting the real schedule ---------------------------
    w_stream_factor = 1 if w_resident else grid[0]
    cost = pl.CostEstimate(
        flops=2 * M_pad * D * H_pad,
        transcendentals=M_pad,  # one rsqrt per row (hoisted out of the j loop)
        bytes_accessed=(M_pad * D * x_isz
                        + w_stream_factor * D * H_pad * w_isz
                        + H_pad * 4
                        + M_pad * H_pad * o_isz),
    )

    # TODO(synk): only add a K ("arbitrary") split with an f32 accumulator if
    # the (D, tile_n) weight tile + x tile genuinely exceed the VMEM budget
    # (roughly D >= 8K on v7x at tile_n=512); a single full-K dot keeps the
    # MXU pipeline full otherwise.
    out2 = pl.pallas_call(
        prenorm_linear_kernel,
        out_shape=jax.ShapeDtypeStruct((M_pad, H_pad), out_dtype),
        grid_spec=pltpu.PrefetchScalarGridSpec(
            num_scalar_prefetch=0,
            grid=grid,
            in_specs=[
                pl.BlockSpec((tile_m_eff, D), lambda i, j: (i, 0)),   # x rows
                pl.BlockSpec((D, tile_n_eff), lambda i, j: (0, j)),   # folded W
                pl.BlockSpec((1, tile_n_eff), lambda i, j: (0, j)),   # folded bias
            ],
            out_specs=pl.BlockSpec((tile_m_eff, tile_n_eff),
                                   lambda i, j: (i, j)),
            scratch_shapes=[pltpu.VMEM((tile_m_eff, D), matmul_dtype)],
        ),
        compiler_params=pltpu.CompilerParams(
            # i: row tiles, independent -> megacore shards them (v7x).
            # j: column tiles reuse the per-i normalized-x scratch -> must run
            #    in order on one core, hence "arbitrary".
            dimension_semantics=("parallel", "arbitrary"),
            vmem_limit_bytes=int(vmem_budget),
        ),
        cost_estimate=cost,
    )(x2, w_f, bias_f)

    return out2[:M, :H].reshape(B, S, H)


if __name__ == "__main__":
    # Small shapes: batch=2, seq=8, dim=32, hidden=64.
    B, S, D, H = 2, 8, 32, 64
    key = jax.random.PRNGKey(0)
    kx, kw, kb, kg, kbe = jax.random.split(key, 5)

    x = jax.random.normal(kx, (B, S, D), dtype=jnp.float32)

    # Non-trivial affine params so the gamma/beta folding is actually tested.
    gamma = 1.0 + 0.1 * jax.random.normal(kg, (D,), dtype=jnp.float32)
    beta = 0.1 * jax.random.normal(kbe, (D,), dtype=jnp.float32)
    # fn = Linear(dim, hidden): small random weights + small bias.
    w = jax.random.normal(kw, (D, H), dtype=jnp.float32) * 0.02
    bias = jax.random.normal(kb, (H,), dtype=jnp.float32) * 0.01

    out = prenorm_linear(x, gamma, beta, w, bias)
    jax.block_until_ready(out)

    # Pure-JAX f32 reference (PyTorch LayerNorm + Linear semantics).
    mean = jnp.mean(x, axis=-1, keepdims=True)
    var = jnp.mean((x - mean) ** 2, axis=-1, keepdims=True)
    normed = (x - mean) * jax.lax.rsqrt(var + EPS) * gamma + beta
    ref = normed @ w + bias

    assert out.shape == (B, S, H)
    # bf16 MXU operands with f32 accumulation -> relaxed tolerance vs f32 ref.
    assert jnp.allclose(out, ref, atol=2e-2, rtol=2e-2), float(
        jnp.max(jnp.abs(out - ref)))

    print("KERNEL_OK")
</pallas_src>

<mosaic_0001>
module attributes {stable_mosaic.version = 11 : i64} {
  func.func @prenorm_linear_kernel(%arg0: i32, %arg1: i32, %arg2: memref<16x32xf32, #tpu.memory_space<vmem>>, %arg3: memref<32x128xbf16, #tpu.memory_space<vmem>>, %arg4: memref<1x128xf32, #tpu.memory_space<vmem>>, %arg5: memref<16x128xf32, #tpu.memory_space<vmem>>, %arg6: memref<16x32xbf16, #tpu.memory_space<vmem>>) attributes {dimension_semantics = [#tpu.dimension_semantics<parallel>, #tpu.dimension_semantics<arbitrary>], iteration_bounds = array<i64: 1, 1>, scalar_prefetch = 0 : i64, scratch_operands = 1 : i64, tpu.core_type = #tpu.core_type<tc>, window_params = [{transform_indices = @transform_0, window_bounds = array<i64: 16, 32>}, {transform_indices = @transform_1, window_bounds = array<i64: 32, 128>}, {transform_indices = @transform_2, window_bounds = array<i64: 1, 128>}, {transform_indices = @transform_3, window_bounds = array<i64: 16, 128>}]} {
    %c0_i32 = arith.constant 0 : i32
    %0 = arith.cmpi eq, %arg1, %c0_i32 : i32
    %1 = arith.extui %0 : i1 to i32
    %c0_i32_0 = arith.constant 0 : i32
    %2 = arith.cmpi ne, %1, %c0_i32_0 : i32
    scf.if %2 {
      %c0_8 = arith.constant 0 : index
      %c0_9 = arith.constant 0 : index
      %10 = vector.load %arg2[%c0_8, %c0_9] : memref<16x32xf32, #tpu.memory_space<vmem>>, vector<16x32xf32>
      %cst_10 = arith.constant dense<0.000000e+00> : vector<16xf32>
      %11 = vector.multi_reduction <add>, %10, %cst_10 [1] : vector<16x32xf32> to vector<16xf32>
      %12 = vector.shape_cast %11 : vector<16xf32> to vector<16x1xf32>
      %cst_11 = arith.constant 3.200000e+01 : f32
      %13 = vector.broadcast %cst_11 : f32 to vector<16x1xf32>
      %14 = arith.divf %12, %13 : vector<16x1xf32>
      %15 = vector.broadcast %14 : vector<16x1xf32> to vector<16x32xf32>
      %16 = arith.subf %10, %15 : vector<16x32xf32>
      %17 = arith.mulf %16, %16 : vector<16x32xf32>
      %cst_12 = arith.constant dense<0.000000e+00> : vector<16xf32>
      %18 = vector.multi_reduction <add>, %17, %cst_12 [1] : vector<16x32xf32> to vector<16xf32>
      %19 = vector.shape_cast %18 : vector<16xf32> to vector<16x1xf32>
      %cst_13 = arith.constant 3.200000e+01 : f32
      %20 = vector.broadcast %cst_13 : f32 to vector<16x1xf32>
      %21 = arith.divf %19, %20 : vector<16x1xf32>
      %cst_14 = arith.constant 9.99999974E-6 : f32
      %22 = vector.broadcast %cst_14 : f32 to vector<16x1xf32>
      %23 = arith.addf %21, %22 : vector<16x1xf32>
      %24 = math.rsqrt %23 : vector<16x1xf32>
      %25 = vector.broadcast %24 : vector<16x1xf32> to vector<16x32xf32>
      %26 = arith.mulf %16, %25 : vector<16x32xf32>
      %27 = arith.truncf %26 : vector<16x32xf32> to vector<16x32xbf16>
      %c0_15 = arith.constant 0 : index
      %c0_16 = arith.constant 0 : index
      %28 = vector.load %arg6[%c0_15, %c0_16] : memref<16x32xbf16, #tpu.memory_space<vmem>>, vector<16x32xbf16>
      tpu.vector_store %arg6[%c0_15, %c0_16], %27 {strides = array<i32>} : memref<16x32xbf16, #tpu.memory_space<vmem>>, vector<16x32xbf16>,
    } else {
    }
    %c0 = arith.constant 0 : index
    %c0_1 = arith.constant 0 : index
    %3 = vector.load %arg6[%c0, %c0_1] : memref<16x32xbf16, #tpu.memory_space<vmem>>, vector<16x32xbf16>
    %c0_2 = arith.constant 0 : index
    %c0_3 = arith.constant 0 : index
    %4 = vector.load %arg3[%c0_2, %c0_3] : memref<32x128xbf16, #tpu.memory_space<vmem>>, vector<32x128xbf16>
    %cst = arith.constant dense<0.000000e+00> : vector<16x128xf32>
    %5 = tpu.matmul %3, %4, %cst {dimension_numbers = #tpu.dot_dimension_numbers<[1], [0], [0], [1], [0, 0, 1, 1], [], []>} : vector<16x32xbf16>, vector<32x128xbf16>, vector<16x128xf32> -> vector<16x128xf32>
    %c0_4 = arith.constant 0 : index
    %c0_5 = arith.constant 0 : index
    %6 = vector.load %arg4[%c0_4, %c0_5] : memref<1x128xf32, #tpu.memory_space<vmem>>, vector<1x128xf32>
    %7 = vector.broadcast %6 : vector<1x128xf32> to vector<16x128xf32>
    %8 = arith.addf %5, %7 : vector<16x128xf32>
    %c0_6 = arith.constant 0 : index
    %c0_7 = arith.constant 0 : index
    %9 = vector.load %arg5[%c0_6, %c0_7] : memref<16x128xf32, #tpu.memory_space<vmem>>, vector<16x128xf32>
    tpu.vector_store %arg5[%c0_6, %c0_7], %8 {strides = array<i32>} : memref<16x128xf32, #tpu.memory_space<vmem>>, vector<16x128xf32>,
    return
  }
  func.func @transform_0(%arg0: i32, %arg1: i32) -> (i32, i32) {
    %c0_i32 = arith.constant 0 : i32
    %c0_i32_0 = arith.constant 0 : i32
    return %arg0, %c0_i32 : i32, i32
  }
  func.func @transform_1(%arg0: i32, %arg1: i32) -> (i32, i32) {
    %c0_i32 = arith.constant 0 : i32
    %c0_i32_0 = arith.constant 0 : i32
    return %c0_i32, %arg1 : i32, i32
  }
  func.func @transform_2(%arg0: i32, %arg1: i32) -> (i32, i32) {
    %c0_i32 = arith.constant 0 : i32
    %c0_i32_0 = arith.constant 0 : i32
    return %c0_i32, %arg1 : i32, i32
  }
  func.func @transform_3(%arg0: i32, %arg1: i32) -> (i32, i32) {
    %c0_i32 = arith.constant 0 : i32
    return %arg0, %arg1 : i32, i32
  }
}

</mosaic_0001>

<bundles_post_ra>
// kernel: tpu_custom_call.1
= control target key start
LH: loop header
LB: loop body
LE: loop exit
PB: predicated region body
PF: predicated region fallthrough
CT: control target
= control target key end

     0   :  { %8 = vsyncpa [#allocation4], 0  ;;  %s338_s0 = inlined_call_operand.hbm [shape: f32[16,32], index: 0, kind: input, shape index: {}]   ;;  %s339_s1 = inlined_call_operand.hbm [shape: bf16[32,128], index: 1, kind: input, shape index: {}]   ;;  %s340_s2 = inlined_call_operand.vmem [shape: f32[1,128], index: 2, kind: input, shape index: {}]   ;;  %s341_s3 = inlined_call_operand.hbm [shape: f32[16,128], index: 3, kind: output, shape index: {}]  }
   0x1   :  { %9 = vsyncpa [#allocation7], 0 }
   0x2   :  { %10 = vsyncpa [#allocation5], 0  ;;  %s15_s14 = sshll.u32 %s338_s0, 4  ;;  %s287_s15 = smov [#allocation3]   ;;  %s16_s14 = int_to_ptr.hbm [resolvable:$true] %s15_s14 }
   0x3   :  { %s17_s16 = sshll.u32 %s287_s15, 4  ;;  %s28_s19 = sshll.u32 %s339_s1, 4  ;;  %s18_s16 = int_to_ptr.vmem [resolvable:$true] %s17_s16  ;;  %s29_s19 = int_to_ptr.hbm [resolvable:$true] %s28_s19 }
   0x4   :  { %s288_s20 = smov 128   ;;  %s289_s21 = smov 8  }
   0x5   :  { %23 = dma.hbm_to_vmem [thread:$0]  %s16_s14, 256, %s18_s16, [#allocation4], %s288_s20, %s288_s20, %s289_s21  }
   0x6   :  { %s290_s22 = smov [#allocation6]   ;;  %s291_s24 = smov 64  }
   0x7   :  { %s30_s23 = sshll.u32 %s290_s22, 4  ;;  %s292_s0 = smov 4   ;;  %s31_s23 = int_to_ptr.vmem [resolvable:$true] %s30_s23 }
   0x8   :  { %36 = dma.hbm_to_vmem [thread:$0]  %s29_s19, 256, %s31_s23, [#allocation7], %s291_s24, %s291_s24, %s292_s0  }
   0x9   :  { %281 = dma.done.wait [#allocation4], 256  }
   0xa   :  { %282 = vsyncadd [#allocation4], 4294967040 }
   0xb   :  { %283 = dma.done.wait [#allocation7], 256  }
   0xc   :  { %284 = vsyncadd [#allocation7], 4294967040  ;;  %vm54_vm0 = vcmask 261120   ;;  %v52_v0 = vld [vmem:[#allocation3] sm:$0xff]  ;;  %v53_v2 = vld [vmem:[#allocation3 + $0x8] sm:$0xff]  ;;  %v293_v4 = vmov 32.0  }
   0xd   :  { %v55_v1 = vsel %vm54_vm0, %v52_v0, 0.0  ;;  %v58_v3 = vsel %vm54_vm0, %v53_v2, 0.0  ;;  %203 = vrcp.f32 %v293_v4  ;;  %v193_v24 = vld [vmem:[#allocation6 + $0x8] sm:$0xff]  ;;  %v192_v25 = vld [vmem:[#allocation6] sm:$0xff]  ;;  %vm108_vm5 = vcmask 257024   ;;  %s294_s26 = smov [#allocation8]  }
   0xe   :  { %56 = vadd.xlane.f32.xlu0 %v55_v1  ;;  %148 = vmatpush.bf16.msra.mxu0 %v193_v24  ;;  %v202_v48 = vld [vmem:[%s340_s2] ss:$0 sm:$0xff]  ;;  %s162_s27 = sshll.u32 %s294_s26, 4  ;;  %s164_s30 = sshll.u32 %s341_s3, 4  ;;  %s163_s27 = int_to_ptr.vmem [resolvable:$true] %s162_s27  ;;  %s165_s30 = int_to_ptr.hbm [resolvable:$true] %s164_s30 }
  0x12   :  { %149 = vmatpush.bf16.msra.mxu0 %v192_v25 }
  0x13   :  { %v204_v5 = vpop.eup %203 }
  0x14   :  { %v62_v6 = vmul.f32 32.0, %v204_v5  ;;  %vm66_vm1 = vweird.f32 %v204_v5 }
  0x16   :  { %59 = vadd.xlane.f32.xlu0 %v58_v3  ;;  %v63_v7 = vsub.f32 1.0, %v62_v6 }
  0x18   :  { %v64_v8 = vmul.f32 %v204_v5, %v63_v7 }
  0x1a   :  { %v65_v9 = vadd.f32 %v204_v5, %v64_v8 }
  0x1c   :  { %v67_v10 = vsel %vm66_vm1, %v204_v5, %v65_v9 }
  0x81   :  { %v57_v11 = vpop.xlane.xlu0 %56 }
  0x82   :  { %v68_v12 = vmul.f32 %v67_v10, %v57_v11 }
  0x84   :  { %v70_v13 = vsub.f32 %v52_v0, %v68_v12 }
  0x86   :  { %v72_v14 = vmul.f32 %v70_v13, %v70_v13 }
  0x88   :  { %v74_v15 = vsel %vm54_vm0, %v72_v14, 0.0 }
  0x89   :  { %75 = vadd.xlane.f32.xlu1 %v74_v15  ;;  %v60_v16 = vpop.xlane.xlu0 %59 }
  0x8a   :  { %v69_v17 = vmul.f32 %v67_v10, %v60_v16 }
  0x8c   :  { %v71_v18 = vsub.f32 %v53_v2, %v69_v17 }
  0x8e   :  { %v73_v19 = vmul.f32 %v71_v18, %v71_v18 }
  0x90   :  { %v77_v20 = vsel %vm54_vm0, %v73_v19, 0.0 }
  0x91   :  { %78 = vadd.xlane.f32.xlu1 %v77_v20 }
  0xfc   :  { %v76_v21 = vpop.xlane.xlu1 %75 }
  0xfd   :  { %v80_v22 = vmul.f32 %v76_v21, %v67_v10 }
  0xff   :  { %v82_v23 = vadd.f32 1e-05, %v80_v22 }
 0x101   :  { %205 = vrsqrt.f32 %v82_v23  ;;  %vm90_vm3 = vweird.f32 %v82_v23 }
 0x104   :  { %v79_v26 = vpop.xlane.xlu1 %78 }
 0x105   :  { %v81_v27 = vmul.f32 %v79_v26, %v67_v10 }
 0x107   :  { %v206_v28 = vpop.eup %205  ;;  %v83_v29 = vadd.f32 1e-05, %v81_v27 }
 0x108   :  { %v85_v30 = vmul.f32 %v206_v28, %v82_v23  ;;  %vm91_vm2 = vweird.f32 %v206_v28 }
 0x109   :  { %207 = vrsqrt.f32 %v83_v29  ;;  %vm92_vm4 = vmor %vm90_vm3, %vm91_vm2  ;;  %vm100_vm7 = vweird.f32 %v83_v29 }
 0x10a   :  { %v86_v31 = vmul.f32 %v206_v28, %v85_v30 }
 0x10c   :  { %v87_v32 = vmul.f32 0.5, %v86_v31 }
 0x10e   :  { %v88_v33 = vsub.f32 1.5, %v87_v32 }
 0x10f   :  { %v208_v34 = vpop.eup %207 }
 0x110   :  { %v89_v35 = vmul.f32 %v206_v28, %v88_v33  ;;  %v95_v36 = vmul.f32 %v208_v34, %v83_v29  ;;  %vm101_vm6 = vweird.f32 %v208_v34 }
 0x111   :  { %vm102_vm8 = vmor %vm100_vm7, %vm101_vm6 }
 0x112   :  { %v93_v37 = vsel %vm92_vm4, %v206_v28, %v89_v35  ;;  %v96_v38 = vmul.f32 %v208_v34, %v95_v36 }
 0x113   :  { %v104_v39 = vmul.f32 %v93_v37, %v70_v13 }
 0x114   :  { %v97_v40 = vmul.f32 0.5, %v96_v38 }
 0x115   :  { %v106_v41 = vpack.c.bf16 %v104_v39, %v104_v39 }
 0x116   :  { %v98_v42 = vsub.f32 1.5, %v97_v40 }
 0x117   :  { %109 = vst.msk [vmem:[#allocation2] sm:$0xf] %vm108_vm5, %v106_v41 }
 0x118   :  { %v99_v43 = vmul.f32 %v208_v34, %v98_v42 }
 0x11a   :  { %v103_v44 = vsel %vm102_vm8, %v208_v34, %v99_v43 }
 0x11b   :  { %v105_v45 = vmul.f32 %v103_v44, %v71_v18 }
 0x11d   :  { %v107_v46 = vpack.c.bf16 %v105_v45, %v105_v45 }
 0x11f   :  { %110 = vst.msk [vmem:[#allocation2 + $0x4] sm:$0xf] %vm108_vm5, %v107_v46 }
 0x126   :  { %v191_v47 = vld [vmem:[#allocation2] sm:$0xff] }
 0x127   :  { %190 = vmatmul.msk.bf16.vlgmr.msra.gmra.mxu0 %vm54_vm0, %v191_v47 }
 0x1a4   :  { %v151_v49 = vpop.f32.mrf.mxu0 }
 0x1a5   :  { %v152_v50 = vadd.f32 %v202_v48, %v151_v49 }
 0x1a7   :  { %156 = vst [vmem:[#allocation8] sm:$0xff] %v152_v50 }
 0x1ac   :  { %v153_v51 = vpop.f32.mrf.mxu0 }
 0x1ad   :  { %v154_v52 = vadd.f32 %v202_v48, %v153_v51 }
 0x1af   :  { %157 = vst [vmem:[#allocation8 + $0x8] sm:$0xff] %v154_v52 }
 0x1b0   :  { %170 = dma.vmem_to_hbm [thread:$0]  %s163_s27, 256, %s165_s30, [#allocation5], %s288_s20, %s288_s20, %s289_s21  }
 0x1b1   :  { %285 = dma.done.wait [#allocation5], 256  }
 0x1b2   :  { %286 = vsyncadd [#allocation5], 4294967040 }
 0x1b3   :  { %175 = vsyncpa [#allocation4], 1 }
 0x1b4   :  { %176 = vsyncpa [#allocation7], 1 }
 0x1b5   :  { %177 = vsyncpa [#allocation5], 1 }

</bundles_post_ra>
